<compile_context>
chip_gen: v5e
topology: v5e:2x2
jax: 0.10.0
libtpu: 0.0.40
codegen_flags: <defaults>
</compile_context>

<pallas_src>
import jax
import jax.numpy as jnp
from jax.experimental import pallas as pl
from jax.experimental.pallas import tpu as pltpu


def _myloss_kernel(da_ref, ta_ref, out_ref, acc_ref):
    i = pl.program_id(0)

    @pl.when(i == 0)
    def _init():
        acc_ref[...] = jnp.zeros_like(acc_ref)

    da = da_ref[...]                  # (C, TN) f32, class-major
    ta = ta_ref[...]                  # (1, TN) i32

    # dn, ind = torch.max(da, dim=class):  max over the (small) sublane axis.
    dn = jnp.max(da, axis=0, keepdims=True)              # (1, TN)
    pred0 = da[0:1, :] == dn                             # ind == 0
    pred1 = jnp.logical_and(da[1:2, :] == dn,
                            jnp.logical_not(pred0))      # ind == 1 (first-max)

    t1 = ta == 1
    t0 = ta == 0

    zero = jnp.zeros_like(dn)
    # rows: [b1, b0, bm1, bm0]
    stacked = jnp.concatenate(
        [
            jnp.where(jnp.logical_and(pred1, t1), dn, zero),
            jnp.where(jnp.logical_and(pred0, t0), dn, zero),
            jnp.where(jnp.logical_or(pred1, t1), dn, zero),
            jnp.where(jnp.logical_or(pred0, t0), dn, zero),
        ],
        axis=0,
    )                                                    # (4, TN)

    acc_ref[...] += jnp.sum(stacked, axis=1, keepdims=True)   # (4, 1)

    @pl.when(i == pl.num_programs(0) - 1)
    def _finalize():
        acc = acc_ref[...]                               # (4, 1)
        num = acc[0:2, :]                                # [b1, b0]
        den = acc[2:4, :]                                # [bm1, bm0]
        loss = jnp.sum(1.0 - num / den)                  # diss1 + diss0
        out_ref[0] = loss
        out_ref[1] = loss


def my_loss(da, ta, *, block_n=2048):
    """da: (N, C) float32 scores; ta: (N,) int labels.

    Returns (loss1, loss1), exactly like PyTorch MyLoss.forward.
    """
    da = jnp.asarray(da, jnp.float32)
    ta = jnp.asarray(ta, jnp.int32)
    n, c = da.shape

    # class-major layout for the kernel
    da_t = da.T                                          # (C, N)
    ta2 = ta.reshape(1, n)                               # (1, N)

    # tile N in lane-dense blocks (multiple of 128); zero-pad the tail
    # (padded columns have dn == 0, so they contribute nothing).
    n_pad = ((n + 127) // 128) * 128
    bn = min(block_n, n_pad)
    bn = ((bn + 127) // 128) * 128
    n_pad = ((n_pad + bn - 1) // bn) * bn
    if n_pad != n:
        da_t = jnp.pad(da_t, ((0, 0), (0, n_pad - n)))
        ta2 = jnp.pad(ta2, ((0, 0), (0, n_pad - n)))
    num_blocks = n_pad // bn

    out = pl.pallas_call(
        _myloss_kernel,
        out_shape=jax.ShapeDtypeStruct((2,), jnp.float32),
        grid=(num_blocks,),
        in_specs=[
            pl.BlockSpec((c, bn), lambda i: (0, i)),
            pl.BlockSpec((1, bn), lambda i: (0, i)),
        ],
        out_specs=pl.BlockSpec(memory_space=pltpu.MemorySpace.SMEM),
        scratch_shapes=[pltpu.VMEM((4, 1), jnp.float32)],
        compiler_params=pltpu.CompilerParams(
            dimension_semantics=("arbitrary",)),
    )(da_t, ta2)

    return out[0], out[1]


def _reference(da, ta):
    # pure-JAX reference matching the torch semantics
    dn = jnp.max(da, axis=1)
    ind = jnp.argmax(da, axis=1)
    b1 = jnp.sum(jnp.where((ind == 1) & (ta == 1), dn, 0.0))
    bm1 = jnp.sum(jnp.where((ind == 1) | (ta == 1), dn, 0.0))
    b0 = jnp.sum(jnp.where((ind == 0) & (ta == 0), dn, 0.0))
    bm0 = jnp.sum(jnp.where((ind == 0) | (ta == 0), dn, 0.0))
    loss = (1.0 - b1 / bm1) + (1.0 - b0 / bm0)
    return loss, loss


if __name__ == "__main__":
    key = jax.random.PRNGKey(0)
    k1, k2 = jax.random.split(key)

    # small single-block case
    N, C = 128, 4
    da = jax.random.normal(k1, (N, C), dtype=jnp.float32)
    ta = jax.random.randint(k2, (N,), 0, C, dtype=jnp.int32)

    loss1, loss2 = my_loss(da, ta)
    jax.block_until_ready((loss1, loss2))
    ref1, ref2 = _reference(da, ta)
    assert jnp.allclose(loss1, ref1, atol=1e-5, rtol=1e-5), (loss1, ref1)
    assert jnp.allclose(loss2, ref2, atol=1e-5, rtol=1e-5), (loss2, ref2)

    # multi-block case (grid > 1) with tail padding
    N2 = 200
    da2 = jax.random.normal(k1, (N2, C), dtype=jnp.float32)
    ta2 = jax.random.randint(k2, (N2,), 0, C, dtype=jnp.int32)
    l1, l2 = my_loss(da2, ta2, block_n=128)
    jax.block_until_ready((l1, l2))
    r1, r2 = _reference(da2, ta2)
    assert jnp.allclose(l1, r1, atol=1e-5, rtol=1e-5), (l1, r1)
    assert jnp.allclose(l2, r2, atol=1e-5, rtol=1e-5), (l2, r2)

    print("KERNEL_OK")
</pallas_src>

<mosaic_0001>
module attributes {stable_mosaic.version = 11 : i64} {
  func.func @_myloss_kernel(%arg0: i32, %arg1: memref<4x128xf32, #tpu.memory_space<vmem>>, %arg2: memref<1x128xi32, #tpu.memory_space<vmem>>, %arg3: memref<2xf32, #tpu.memory_space<smem>>, %arg4: memref<4x1xf32, #tpu.memory_space<vmem>>) attributes {dimension_semantics = [#tpu.dimension_semantics<arbitrary>], iteration_bounds = array<i64: 1>, scalar_prefetch = 0 : i64, scratch_operands = 1 : i64, tpu.core_type = #tpu.core_type<tc>, window_params = [{transform_indices = @transform_0, window_bounds = array<i64: 4, 128>}, {transform_indices = @transform_1, window_bounds = array<i64: 1, 128>}, {transform_indices = @transform_2, window_bounds = array<i64: 2>}]} {
    %c0_i32 = arith.constant 0 : i32
    %0 = arith.cmpi eq, %arg0, %c0_i32 : i32
    %1 = arith.extui %0 : i1 to i32
    %c0_i32_0 = arith.constant 0 : i32
    %2 = arith.cmpi ne, %1, %c0_i32_0 : i32
    scf.if %2 {
      %cst_14 = arith.constant 0.000000e+00 : f32
      %35 = vector.broadcast %cst_14 : f32 to vector<4x1xf32>
      %c0_15 = arith.constant 0 : index
      %c0_16 = arith.constant 0 : index
      %36 = vector.load %arg4[%c0_15, %c0_16] : memref<4x1xf32, #tpu.memory_space<vmem>>, vector<4x1xf32>
      tpu.vector_store %arg4[%c0_15, %c0_16], %35 {strides = array<i32>} : memref<4x1xf32, #tpu.memory_space<vmem>>, vector<4x1xf32>,
    } else {
    }
    %c0 = arith.constant 0 : index
    %c0_1 = arith.constant 0 : index
    %3 = vector.load %arg1[%c0, %c0_1] : memref<4x128xf32, #tpu.memory_space<vmem>>, vector<4x128xf32>
    %c0_2 = arith.constant 0 : index
    %c0_3 = arith.constant 0 : index
    %4 = vector.load %arg2[%c0_2, %c0_3] : memref<1x128xi32, #tpu.memory_space<vmem>>, vector<1x128xi32>
    %cst = arith.constant dense<0xFF800000> : vector<128xf32>
    %5 = vector.multi_reduction <maximumf>, %3, %cst [0] : vector<4x128xf32> to vector<128xf32>
    %6 = vector.shape_cast %5 : vector<128xf32> to vector<1x128xf32>
    %7 = vector.extract_strided_slice %3 {offsets = [0, 0], sizes = [1, 128], strides = [1, 1]} : vector<4x128xf32> to vector<1x128xf32>
    %8 = arith.cmpf oeq, %7, %6 : vector<1x128xf32>
    %9 = vector.extract_strided_slice %3 {offsets = [1, 0], sizes = [1, 128], strides = [1, 1]} : vector<4x128xf32> to vector<1x128xf32>
    %10 = arith.cmpf oeq, %9, %6 : vector<1x128xf32>
    %cst_4 = arith.constant dense<true> : vector<1x128xi1>
    %11 = arith.xori %8, %cst_4 : vector<1x128xi1>
    %12 = arith.andi %10, %11 : vector<1x128xi1>
    %c1_i32 = arith.constant 1 : i32
    %13 = vector.broadcast %c1_i32 : i32 to vector<1x128xi32>
    %14 = arith.cmpi eq, %4, %13 : vector<1x128xi32>
    %c0_i32_5 = arith.constant 0 : i32
    %15 = vector.broadcast %c0_i32_5 : i32 to vector<1x128xi32>
    %16 = arith.cmpi eq, %4, %15 : vector<1x128xi32>
    %cst_6 = arith.constant 0.000000e+00 : f32
    %17 = vector.broadcast %cst_6 : f32 to vector<1x128xf32>
    %18 = arith.andi %12, %14 : vector<1x128xi1>
    %19 = arith.select %18, %6, %17 : vector<1x128xi1>, vector<1x128xf32>
    %20 = arith.andi %8, %16 : vector<1x128xi1>
    %21 = arith.select %20, %6, %17 : vector<1x128xi1>, vector<1x128xf32>
    %22 = arith.ori %12, %14 : vector<1x128xi1>
    %23 = arith.select %22, %6, %17 : vector<1x128xi1>, vector<1x128xf32>
    %24 = arith.ori %8, %16 : vector<1x128xi1>
    %25 = arith.select %24, %6, %17 : vector<1x128xi1>, vector<1x128xf32>
    %26 = tpu.concatenate %19, %21, %23, %25 in 0 : vector<1x128xf32>, vector<1x128xf32>, vector<1x128xf32>, vector<1x128xf32> -> vector<4x128xf32>
    %c0_7 = arith.constant 0 : index
    %c0_8 = arith.constant 0 : index
    %27 = vector.load %arg4[%c0_7, %c0_8] : memref<4x1xf32, #tpu.memory_space<vmem>>, vector<4x1xf32>
    %cst_9 = arith.constant dense<0.000000e+00> : vector<4xf32>
    %28 = vector.multi_reduction <add>, %26, %cst_9 [1] : vector<4x128xf32> to vector<4xf32>
    %29 = vector.shape_cast %28 : vector<4xf32> to vector<4x1xf32>
    %30 = arith.addf %27, %29 : vector<4x1xf32>
    %c0_10 = arith.constant 0 : index
    %c0_11 = arith.constant 0 : index
    %31 = vector.load %arg4[%c0_10, %c0_11] : memref<4x1xf32, #tpu.memory_space<vmem>>, vector<4x1xf32>
    tpu.vector_store %arg4[%c0_10, %c0_11], %30 {strides = array<i32>} : memref<4x1xf32, #tpu.memory_space<vmem>>, vector<4x1xf32>,
    %c0_i32_12 = arith.constant 0 : i32
    %32 = arith.cmpi eq, %arg0, %c0_i32_12 : i32
    %33 = arith.extui %32 : i1 to i32
    %c0_i32_13 = arith.constant 0 : i32
    %34 = arith.cmpi ne, %33, %c0_i32_13 : i32
    scf.if %34 {
      %c0_14 = arith.constant 0 : index
      %c0_15 = arith.constant 0 : index
      %35 = vector.load %arg4[%c0_14, %c0_15] : memref<4x1xf32, #tpu.memory_space<vmem>>, vector<4x1xf32>
      %36 = vector.extract_strided_slice %35 {offsets = [0, 0], sizes = [2, 1], strides = [1, 1]} : vector<4x1xf32> to vector<2x1xf32>
      %37 = vector.extract_strided_slice %35 {offsets = [2, 0], sizes = [2, 1], strides = [1, 1]} : vector<4x1xf32> to vector<2x1xf32>
      %38 = arith.divf %36, %37 : vector<2x1xf32>
      %cst_16 = arith.constant 1.000000e+00 : f32
      %39 = vector.broadcast %cst_16 : f32 to vector<2x1xf32>
      %40 = arith.subf %39, %38 : vector<2x1xf32>
      %41 = vector.shape_cast %40 : vector<2x1xf32> to vector<1x2x1xf32>
      %cst_17 = arith.constant dense<0.000000e+00> : vector<1xf32>
      %42 = vector.multi_reduction <add>, %41, %cst_17 [1, 2] : vector<1x2x1xf32> to vector<1xf32>
      %43 = vector.shape_cast %42 : vector<1xf32> to vector<1x1x1xf32>
      %44 = vector.extract %43[0, 0, 0] : f32 from vector<1x1x1xf32>
      %c0_18 = arith.constant 0 : index
      %45 = memref.load %arg3[%c0_18] : memref<2xf32, #tpu.memory_space<smem>>
      memref.store %44, %arg3[%c0_18] : memref<2xf32, #tpu.memory_space<smem>>
      %c1 = arith.constant 1 : index
      %46 = memref.load %arg3[%c1] : memref<2xf32, #tpu.memory_space<smem>>
      memref.store %44, %arg3[%c1] : memref<2xf32, #tpu.memory_space<smem>>
    } else {
    }
    return
  }
  func.func @transform_0(%arg0: i32) -> (i32, i32) {
    %c0_i32 = arith.constant 0 : i32
    %c0_i32_0 = arith.constant 0 : i32
    return %c0_i32, %arg0 : i32, i32
  }
  func.func @transform_1(%arg0: i32) -> (i32, i32) {
    %c0_i32 = arith.constant 0 : i32
    %c0_i32_0 = arith.constant 0 : i32
    return %c0_i32, %arg0 : i32, i32
  }
  func.func @transform_2(%arg0: i32) -> i32 {
    %c0_i32 = arith.constant 0 : i32
    %c0_i32_0 = arith.constant 0 : i32
    return %c0_i32 : i32
  }
}

</mosaic_0001>

<bundles_post_ra>
// kernel: tpu_custom_call.1
= control target key start
LH: loop header
LB: loop body
LE: loop exit
PB: predicated region body
PF: predicated region fallthrough
CT: control target
= control target key end

     0   :  { %7 = vsyncpa [#allocation4], 0  ;;  %s265_s0 = inlined_call_operand.hbm [shape: f32[4,128], index: 0, kind: input, shape index: {}]   ;;  %s266_s1 = inlined_call_operand.hbm [shape: s32[1,128], index: 1, kind: input, shape index: {}]   ;;  %s267_s2 = inlined_call_operand.hbm [shape: f32[2], index: 2, kind: output, shape index: {}]  }
   0x1   :  { %8 = vsyncpa [#allocation7], 0 }
   0x2   :  { %9 = vsyncpa [#allocation5], 0  ;;  %s15_s11 = sshll.u32 %s265_s0, 4  ;;  %s231_s12 = smov [#allocation3]   ;;  %s16_s11 = int_to_ptr.hbm [resolvable:$true] %s15_s11 }
   0x3   :  { %s17_s13 = sshll.u32 %s231_s12, 4  ;;  %s26_s16 = sshll.u32 %s266_s1, 4  ;;  %s18_s13 = int_to_ptr.vmem [resolvable:$true] %s17_s13  ;;  %s27_s16 = int_to_ptr.hbm [resolvable:$true] %s26_s16 }
   0x4   :  { %20 = dma.hbm_to_vmem [thread:$0]  %s16_s11, 64, %s18_s13, [#allocation4]  }
   0x5   :  { %s232_s17 = smov [#allocation6]  }
   0x6   :  { %s28_s18 = sshll.u32 %s232_s17, 4  ;;  %s29_s18 = int_to_ptr.vmem [resolvable:$true] %s28_s18 }
   0x7   :  { %31 = dma.hbm_to_vmem [thread:$0]  %s27_s16, 16, %s29_s18, [#allocation7]  }
   0x8   :  { %225 = dma.done.wait [#allocation4], 64  }
   0x9   :  { %226 = vsyncadd [#allocation4], 4294967232 }
   0xa   :  { %227 = dma.done.wait [#allocation7], 16  }
   0xb   :  { %228 = vsyncadd [#allocation7], 4294967280  ;;  %vm44_vm0 = vcmask 3072   ;;  %vm48_vm1 = vcmask 1043456   ;;  %v233_v0 = vmov 0.0   ;;  %v234_v9 = vmov 0  }
   0xc   :  { %45 = vst.msk [vmem:[#allocation2] sm:$0xf] %vm44_vm0, %v233_v0  ;;  %v46_v1 = vld [vmem:[#allocation3] sm:$0xf]  ;;  %v47_v5 = vld [vmem:[#allocation6] sm:$0x1] }
   0xd   :  { %v49_v2 = vsel %vm48_vm1, %v46_v1, -inf  ;;  %vm62_vm2 = vcmp.eq.s32.totalorder %v47_v5, 1  ;;  %vm63_vm3 = vcmp.eq.s32.totalorder %v47_v5, 0  ;;  %vm235_vm5 = vmmov 1   ;;  %s143_s19 = sshll.u32 %s267_s2, 4  ;;  %s236_s21 = smov [#allocation8]   ;;  %s144_s19 = int_to_ptr.hbm [resolvable:$true] %s143_s19 }
   0xe   :  { %v50_v3 = vrot.slane %v49_v2, 4  ;;  %v64_v10 = vsel %vm62_vm2, 1, %v234_v9  ;;  %vm87_vm14 = vcmask 1040384   ;;  %vm89_vm15 = vcmask 1041408  }
   0xf   :  { %v65_v12 = vperm.slane %v64_v10, 0  ;;  %vm91_vm2 = vcmask 1042432  }
  0x10   :  { %v51_v4 = vmax.f32 %v49_v2, %v50_v3 }
  0x11   :  { %vm66_vm9 = vcmp.ne.s32.totalorder %v65_v12, 0 }
  0x12   :  { %v52_v6 = vrot.slane %v51_v4, 2 }
  0x13   :  { %v93_v27 = vld [vmem:[#allocation2] sm:$0xf] }
  0x14   :  { %v53_v7 = vmax.f32 %v51_v4, %v52_v6 }
  0x16   :  { %v54_v8 = vrot.slane %v53_v7, 1 }
  0x18   :  { %v55_v11 = vmax.f32 %v53_v7, %v54_v8 }
  0x1a   :  { %vm56_vm4 = vcmp.eq.f32.partialorder %v46_v1, %v55_v11 }
  0x1b   :  { %vm57_vm6 = vmxor %vm56_vm4, %vm235_vm5 }
  0x1c   :  { %v58_v13 = vsel %vm57_vm6, 1, %v234_v9  ;;  %vm69_vm7 = vmand %vm56_vm4, %vm63_vm3  ;;  %vm123_vm6 = vcmask 1024  }
  0x1d   :  { %v59_v14 = vrot.slane %v58_v13, 7  ;;  %vm73_vm8 = vmor %vm56_vm4, %vm63_vm3  ;;  %v70_v15 = vsel %vm69_vm7, %v55_v11, 0.0 }
  0x1e   :  { %v74_v16 = vsel %vm73_vm8, %v55_v11, 0.0  ;;  %v79_v17 = vrot.slane %v70_v15, 7 }
  0x1f   :  { %vm60_vm10 = vcmp.ne.s32.totalorder %v59_v14, 0  ;;  %v85_v21 = vrot.slane %v74_v16, 5 }
  0x20   :  { %vm61_vm11 = vmand %vm56_vm4, %vm60_vm10 }
  0x21   :  { %vm67_vm12 = vmand %vm61_vm11, %vm66_vm9 }
  0x22   :  { %v68_v18 = vsel %vm67_vm12, %v55_v11, 0.0  ;;  %vm71_vm13 = vmor %vm61_vm11, %vm66_vm9 }
  0x23   :  { %v72_v19 = vsel %vm71_vm13, %v55_v11, 0.0  ;;  %v76_v20 = vrot.slane %v68_v18, 1 }
  0x24   :  { %v82_v22 = vrot.slane %v72_v19, 7 }
  0x25   :  { %v88_v23 = vsel %vm87_vm14, %v76_v20, %v79_v17 }
  0x26   :  { %v90_v24 = vsel %vm89_vm15, %v88_v23, %v82_v22 }
  0x27   :  { %v92_v25 = vsel %vm91_vm2, %v90_v24, %v85_v21 }
  0x28   :  { %v94_v26 = vsel %vm48_vm1, %v92_v25, 0.0 }
  0x29   :  { %95 = vadd.xlane.f32.xlu0 %v94_v26 }
  0x9c   :  { %v96_v28 = vpop.xlane.xlu0 %95 }
  0x9d   :  { %v97_v29 = vadd.f32 %v96_v28, %v93_v27 }
  0x9f   :  { %99 = vst.msk [vmem:[#allocation2] sm:$0xf] %vm44_vm0, %v97_v29 }
  0xa6   :  { %v103_v30 = vld [vmem:[#allocation2] sm:$0xf] }
  0xa7   :  { %v105_v31 = vrot.slane %v103_v30, 2 }
  0xa9   :  { %163 = vrcp.f32 %v105_v31  ;;  %v118_v35 = vand.u32 2147483648, %v105_v31  ;;  %v116_v37 = vand.u32 2147483647, %v105_v31  ;;  %vm112_vm4 = vweird.f32 %v105_v31 }
  0xab   :  { %v119_v39 = vor.u32 1.1754944e-38, %v118_v35  ;;  %vm117_vm1 = vcmp.eq.f32.partialorder %v116_v37, 8.507059e+37 }
  0xaf   :  { %v164_v32 = vpop.eup %163 }
  0xb0   :  { %v108_v33 = vmul.f32 %v164_v32, %v105_v31  ;;  %vm113_vm3 = vweird.f32 %v164_v32 }
  0xb1   :  { %vm114_vm5 = vmor %vm112_vm4, %vm113_vm3 }
  0xb2   :  { %v109_v34 = vsub.f32 1.0, %v108_v33 }
  0xb4   :  { %v110_v36 = vmul.f32 %v164_v32, %v109_v34 }
  0xb6   :  { %v111_v38 = vadd.f32 %v164_v32, %v110_v36 }
  0xb8   :  { %v115_v40 = vsel %vm114_vm5, %v164_v32, %v111_v38 }
  0xb9   :  { %v120_v41 = vsel %vm117_vm1, %v119_v39, %v115_v40 }
  0xba   :  { %v121_v42 = vmul.f32 %v120_v41, %v103_v30 }
  0xbc   :  { %v122_v43 = vsub.f32 1.0, %v121_v42 }
  0xbe   :  { %v124_v44 = vsel %vm123_vm6, %v122_v43, 0.0 }
  0xbf   :  { %125 = vadd.xlane.f32.xlu0 %v124_v44 }
 0x132   :  { %v126_v45 = vpop.xlane.xlu0 %125 }
 0x133   :  { %v127_v46 = vrot.slane %v126_v45, 4 }
 0x135   :  { %v128_v47 = vadd.f32 %v127_v46, %v126_v45 }
 0x137   :  { %v129_v48 = vrot.slane %v128_v47, 2 }
 0x139   :  { %v130_v49 = vadd.f32 %v129_v48, %v128_v47 }
 0x13b   :  { %v131_v50 = vrot.slane %v130_v49, 1 }
 0x13d   :  { %v132_v51 = vadd.f32 %v131_v50, %v130_v49 }
 0x13f   :  { %155 = vpush %v132_v51 }
 0x170   :  { %s156_s20 = spop %155 }
 0x171   :  { %135 = sst [smem:[#allocation8]] %s156_s20 }
 0x172   :  { %137 = sst [smem:[#allocation8 + $0x1]] %s156_s20 }
 0x173   :  { %146 = dma.smem_to_hbm %s236_s21, 16, %s144_s19, [#allocation5]  }
 0x174   :  { %229 = dma.done.wait [#allocation5], 16  }
 0x175   :  { %230 = vsyncadd [#allocation5], 4294967280 }
 0x176   :  { %151 = sfence }
 0x177   :  { %152 = vsyncpa [#allocation4], 1 }
 0x178   :  { %153 = vsyncpa [#allocation7], 1 }
 0x179   :  { %154 = vsyncpa [#allocation5], 1 }

</bundles_post_ra>
